<compile_context>
chip_gen: v7x
topology: tpu7x:2x2x1
jax: 0.10.0
libtpu: 0.0.40
codegen_flags: <defaults>
</compile_context>

<pallas_src>
import math

import jax
import jax.numpy as jnp
from jax.experimental import pallas as pl
from jax.experimental.pallas import tpu as pltpu

_LANES = 128
_SUB = 32                       # row granularity safe for 8/16/32-bit sublane tiling
_TARGET_BLOCK_BYTES = 2 << 20   # ~2 MiB per widest-dtype operand block
_VMEM_LIMIT_BYTES = 32 << 20    # explicit scoped-VMEM limit, safe on v5e/v6e/v7x


def _make_kernel(is_scalar):
    """Elementwise (x - t)^2 * w; is_scalar marks operands read as SMEM scalars."""
    sx, st, sw = is_scalar

    def kernel(x_ref, t_ref, w_ref, o_ref):
        x = (x_ref[0] if sx else x_ref[...]).astype(jnp.float32)
        t = (t_ref[0] if st else t_ref[...]).astype(jnp.float32)
        w = (w_ref[0] if sw else w_ref[...]).astype(jnp.float32)
        d = x - t
        o_ref[...] = (d * d * w).astype(o_ref.dtype)

    return kernel


def _ref_math(x, t, w, out_dtype):
    """Reference math (same f32 compute path as the kernel) for tiny tails."""
    d = x.astype(jnp.float32) - t.astype(jnp.float32)
    return (d * d * w.astype(jnp.float32)).astype(out_dtype)


def weighted_mse_loss(inputs, targets, weights):
    """Elementwise (inputs - targets)**2 * weights via a Pallas TPU kernel."""
    inputs, targets, weights = map(jnp.asarray, (inputs, targets, weights))

    # PyTorch broadcasting / type-promotion semantics.
    out_shape = jnp.broadcast_shapes(inputs.shape, targets.shape, weights.shape)
    out_dtype = jnp.result_type(inputs.dtype, targets.dtype, weights.dtype)
    # TODO(synk): integer inputs round-trip through f32 in-kernel, which can lose
    # precision for |values| > 2**24 (PyTorch computes in the integer dtype).
    n = math.prod(out_shape) if out_shape else 1
    if n == 0:
        return jnp.zeros(out_shape, out_dtype)

    rows = n // _LANES          # full 128-lane rows handled by the kernel
    main_n = rows * _LANES
    if rows == 0:
        # Tiny problem (< 128 elements): a kernel launch is not worth it.
        return _ref_math(jnp.broadcast_to(inputs, out_shape),
                         jnp.broadcast_to(targets, out_shape),
                         jnp.broadcast_to(weights, out_shape), out_dtype)

    operands = (inputs, targets, weights)
    is_scalar = tuple(op.size == 1 for op in operands)

    # ---- Block sizing: ~2 MiB for the widest streamed dtype, multiple of 32 rows.
    item_sizes = [jnp.dtype(out_dtype).itemsize] + [
        op.dtype.itemsize for op, s in zip(operands, is_scalar) if not s]
    max_item = max(item_sizes)
    tr_target = max(_SUB, (_TARGET_BLOCK_BYTES // (_LANES * max_item)) // _SUB * _SUB)

    if rows > tr_target:
        tr = tr_target
    elif rows >= 4 * _SUB:
        # Fits in one tile: split into >=4 steps so v7x's 2 TensorCores each
        # get >=2 pipelined steps (neutral on v5e/v6e).
        tr = (-(-rows // 4) + _SUB - 1) // _SUB * _SUB
    else:
        tr = rows               # single block == full array dims (always legal)
    grid = (pl.cdiv(rows, tr),)

    block_spec = pl.BlockSpec((tr, _LANES), lambda i: (i, 0))
    smem_spec = pl.BlockSpec(memory_space=pltpu.MemorySpace.SMEM)

    # ---- Per-operand prep (no wrapper astype, no pad):
    #   * size-1 operand       -> 4-byte f32 scalar in SMEM, broadcast in-kernel
    #   * full-shape operand   -> free contiguous reshape to (rows, 128)
    #   * other shapes         -> broadcast_to fallback (fused into the input DMA
    #                             by allow_input_fusion when possible)
    kern_args, in_specs, fusion, tails = [], [], [], []
    bytes_accessed = n * jnp.dtype(out_dtype).itemsize
    for op, scalar in zip(operands, is_scalar):
        if scalar:
            kern_args.append(op.astype(jnp.float32).reshape(1))
            in_specs.append(smem_spec)
            fusion.append(False)
            tails.append(op.reshape(()))
        else:
            flat = jnp.broadcast_to(op, out_shape).reshape(-1)
            main = flat if main_n == n else flat[:main_n]
            kern_args.append(main.reshape(rows, _LANES))
            in_specs.append(block_spec)
            fusion.append(True)
            tails.append(None if main_n == n else flat[main_n:])
            bytes_accessed += n * op.dtype.itemsize

    out2 = pl.pallas_call(
        _make_kernel(is_scalar),
        out_shape=jax.ShapeDtypeStruct((rows, _LANES), out_dtype),
        grid=grid,
        in_specs=in_specs,
        out_specs=block_spec,
        compiler_params=pltpu.CompilerParams(
            dimension_semantics=("parallel",),
            allow_input_fusion=fusion,
            vmem_limit_bytes=_VMEM_LIMIT_BYTES,
        ),
        cost_estimate=pl.CostEstimate(
            flops=3 * main_n,
            transcendentals=0,
            bytes_accessed=int(bytes_accessed),
        ),
    )(*kern_args)

    out_flat = out2.reshape(-1)
    if main_n != n:
        # <128-element ragged tail computed with plain jnp (same f32 math).
        tx, tt, tw = tails
        out_flat = jnp.concatenate([out_flat, _ref_math(tx, tt, tw, out_dtype)])
    return out_flat.reshape(out_shape)


if __name__ == "__main__":
    key = jax.random.PRNGKey(0)
    k1, k2, k3 = jax.random.split(key, 3)

    # 1) Full-shape f32, NCHW-like: batch=2, channels=4, spatial=16x16.
    shape = (2, 4, 16, 16)
    x = jax.random.normal(k1, shape, dtype=jnp.float32)
    t = jax.random.normal(k2, shape, dtype=jnp.float32)
    w = jax.random.uniform(k3, shape, dtype=jnp.float32)
    out = jax.block_until_ready(weighted_mse_loss(x, t, w))
    ref = (x - t) ** 2 * w
    assert out.shape == ref.shape and out.dtype == ref.dtype
    assert jnp.allclose(out, ref, atol=1e-6, rtol=1e-6)

    # 2) Ragged element count + per-channel broadcast weights (tail + broadcast paths).
    shape2 = (2, 4, 15, 13)
    a = jax.random.normal(k1, shape2, dtype=jnp.float32)
    b = jax.random.normal(k2, shape2, dtype=jnp.float32)
    w_ch = jax.random.uniform(k3, (1, 4, 1, 1), dtype=jnp.float32)
    out2 = jax.block_until_ready(weighted_mse_loss(a, b, w_ch))
    ref2 = (a - b) ** 2 * w_ch
    assert out2.shape == ref2.shape
    assert jnp.allclose(out2, ref2, atol=1e-6, rtol=1e-6)

    # 3) Mixed dtypes + scalar weight (SMEM scalar path, in-kernel f32 upcast).
    xb = jax.random.normal(k1, shape, dtype=jnp.bfloat16)
    tb = jax.random.normal(k2, shape, dtype=jnp.bfloat16)
    ws = jnp.float32(0.5)
    out3 = jax.block_until_ready(weighted_mse_loss(xb, tb, ws))
    ref3 = (xb.astype(jnp.float32) - tb.astype(jnp.float32)) ** 2 * jnp.float32(0.5)
    assert out3.shape == ref3.shape and out3.dtype == ref3.dtype
    assert jnp.allclose(out3, ref3, atol=1e-5, rtol=1e-5)

    print("KERNEL_OK")
</pallas_src>

<mosaic_0001>
module attributes {stable_mosaic.version = 11 : i64} {
  func.func @kernel(%arg0: i32, %arg1: memref<16x128xf32, #tpu.memory_space<vmem>>, %arg2: memref<16x128xf32, #tpu.memory_space<vmem>>, %arg3: memref<16x128xf32, #tpu.memory_space<vmem>>, %arg4: memref<16x128xf32, #tpu.memory_space<vmem>>) attributes {dimension_semantics = [#tpu.dimension_semantics<parallel>], iteration_bounds = array<i64: 1>, scalar_prefetch = 0 : i64, scratch_operands = 0 : i64, tpu.core_type = #tpu.core_type<tc>, window_params = [{transform_indices = @transform_0, window_bounds = array<i64: 16, 128>}, {transform_indices = @transform_1, window_bounds = array<i64: 16, 128>}, {transform_indices = @transform_2, window_bounds = array<i64: 16, 128>}, {transform_indices = @transform_3, window_bounds = array<i64: 16, 128>}]} {
    %c0 = arith.constant 0 : index
    %c0_0 = arith.constant 0 : index
    %0 = vector.load %arg1[%c0, %c0_0] : memref<16x128xf32, #tpu.memory_space<vmem>>, vector<16x128xf32>
    %c0_1 = arith.constant 0 : index
    %c0_2 = arith.constant 0 : index
    %1 = vector.load %arg2[%c0_1, %c0_2] : memref<16x128xf32, #tpu.memory_space<vmem>>, vector<16x128xf32>
    %c0_3 = arith.constant 0 : index
    %c0_4 = arith.constant 0 : index
    %2 = vector.load %arg3[%c0_3, %c0_4] : memref<16x128xf32, #tpu.memory_space<vmem>>, vector<16x128xf32>
    %3 = arith.subf %0, %1 : vector<16x128xf32>
    %4 = arith.mulf %3, %3 : vector<16x128xf32>
    %5 = arith.mulf %4, %2 : vector<16x128xf32>
    %c0_5 = arith.constant 0 : index
    %c0_6 = arith.constant 0 : index
    %6 = vector.load %arg4[%c0_5, %c0_6] : memref<16x128xf32, #tpu.memory_space<vmem>>, vector<16x128xf32>
    tpu.vector_store %arg4[%c0_5, %c0_6], %5 {strides = array<i32>} : memref<16x128xf32, #tpu.memory_space<vmem>>, vector<16x128xf32>,
    return
  }
  func.func @transform_0(%arg0: i32) -> (i32, i32) {
    %c0_i32 = arith.constant 0 : i32
    %c0_i32_0 = arith.constant 0 : i32
    return %arg0, %c0_i32 : i32, i32
  }
  func.func @transform_1(%arg0: i32) -> (i32, i32) {
    %c0_i32 = arith.constant 0 : i32
    %c0_i32_0 = arith.constant 0 : i32
    return %arg0, %c0_i32 : i32, i32
  }
  func.func @transform_2(%arg0: i32) -> (i32, i32) {
    %c0_i32 = arith.constant 0 : i32
    %c0_i32_0 = arith.constant 0 : i32
    return %arg0, %c0_i32 : i32, i32
  }
  func.func @transform_3(%arg0: i32) -> (i32, i32) {
    %c0_i32 = arith.constant 0 : i32
    %c0_i32_0 = arith.constant 0 : i32
    return %arg0, %c0_i32 : i32, i32
  }
}

</mosaic_0001>

<bundles_post_ra>
// kernel: tpu_custom_call.1
= control target key start
LH: loop header
LB: loop body
LE: loop exit
PB: predicated region body
PF: predicated region fallthrough
CT: control target
= control target key end

     0   :  { %8 = vsyncpa [#allocation3], 0  ;;  %s281_s0 = inlined_call_operand.hbm [shape: f32[16,128], index: 0, kind: input, shape index: {}]   ;;  %s282_s1 = inlined_call_operand.hbm [shape: f32[16,128], index: 1, kind: input, shape index: {}]   ;;  %s283_s2 = inlined_call_operand.hbm [shape: f32[16,128], index: 2, kind: input, shape index: {}]   ;;  %s284_s3 = inlined_call_operand.hbm [shape: f32[16,128], index: 3, kind: output, shape index: {}]  }
   0x1   :  { %9 = vsyncpa [#allocation6], 0 }
   0x2   :  { %10 = vsyncpa [#allocation4], 0  ;;  %s188_s12 = smov [#allocation5]   ;;  %s189_s14 = smov [#allocation2]  }
   0x3   :  { %s28_s13 = sshll.u32 %s188_s12, 4  ;;  %s16_s15 = sshll.u32 %s189_s14, 4  ;;  %s29_s13 = int_to_ptr.vmem [resolvable:$true] %s28_s13  ;;  %s214_s15 = int_to_ptr.vmem [resolvable:$true] %s16_s15 }
   0x4   :  { %s94_s18 = scalar_lea.hbm %s282_s1, 256 }
   0x5   :  { %p95_p0 = scmp.ne.s32.totalorder %s282_s1, %s94_s18  ;;  %p98_p1 = scmp.lt.u32.totalorder %s94_s18, %s282_s1 }
   0x7   :  { %p100_p2 = pnand %p98_p1, %p95_p0 }
   0x9   :  { %103 = shalt.err (!%p100_p2)
}
   0xa   :  { %s104_s23 = scalar_lea.vmem %s29_s13, 256  ;;  %p109_p4 = scmp.lt.s32.totalorder %s29_s13, %s29_s13 }
   0xb   :  { %p105_p3 = scmp.ne.s32.totalorder %s29_s13, %s104_s23  ;;  %p110_p5 = scmp.lt.s32.totalorder %s104_s23, %s104_s23 }
   0xd   :  { %p111_p6 = por %p110_p5, %p109_p4 }
   0xf   :  { %p112_p7 = pnand %p111_p6, %p105_p3 }
  0x11   :  { %115 = shalt.err (!%p112_p7)
}
  0x12   :  { %s190_s24 = smov 128   ;;  %s191_s25 = smov 8  }
  0x13   :  { %34 = dma.hbm_to_vmem [thread:$0]  %s282_s1, 256, %s29_s13, [#allocation6], %s190_s24, %s190_s24, %s191_s25  }
  0x14   :  { %s116_s30 = scalar_lea.hbm %s281_s0, 256 }
  0x15   :  { %p117_p8 = scmp.ne.s32.totalorder %s281_s0, %s116_s30  ;;  %p120_p9 = scmp.lt.u32.totalorder %s116_s30, %s281_s0 }
  0x17   :  { %p122_p10 = pnand %p120_p9, %p117_p8 }
  0x19   :  { %125 = shalt.err (!%p122_p10)
}
  0x1a   :  { %s126_s8 = scalar_lea.vmem %s214_s15, 256  ;;  %p131_p12 = scmp.lt.s32.totalorder %s214_s15, %s214_s15 }
  0x1b   :  { %p127_p11 = scmp.ne.s32.totalorder %s214_s15, %s126_s8  ;;  %p132_p13 = scmp.lt.s32.totalorder %s126_s8, %s126_s8 }
  0x1d   :  { %p133_p0 = por %p132_p13, %p131_p12 }
  0x1f   :  { %p134_p1 = pnand %p133_p0, %p127_p11 }
  0x21   :  { %137 = shalt.err (!%p134_p1)
}
  0x22   :  { %22 = dma.hbm_to_vmem [thread:$0]  %s281_s0, 256, %s214_s15, [#allocation3], %s190_s24, %s190_s24, %s191_s25  }
  0x23   :  { %s192_s10 = smov [#allocation7]   ;;  %s138_s14 = scalar_lea.hbm %s283_s2, 256 }
  0x24   :  { %s40_s11 = sshll.u32 %s192_s10, 4  ;;  %p139_p2 = scmp.ne.s32.totalorder %s283_s2, %s138_s14  ;;  %s41_s11 = int_to_ptr.vmem [resolvable:$true] %s40_s11 }
  0x25   :  { %p142_p3 = scmp.lt.u32.totalorder %s138_s14, %s283_s2 }
  0x27   :  { %p144_p4 = pnand %p142_p3, %p139_p2 }
  0x29   :  { %147 = shalt.err (!%p144_p4)
}
  0x2a   :  { %s148_s20 = scalar_lea.vmem %s41_s11, 256  ;;  %p153_p6 = scmp.lt.s32.totalorder %s41_s11, %s41_s11 }
  0x2b   :  { %p149_p5 = scmp.ne.s32.totalorder %s41_s11, %s148_s20  ;;  %p154_p7 = scmp.lt.s32.totalorder %s148_s20, %s148_s20 }
  0x2d   :  { %p155_p8 = por %p154_p7, %p153_p6 }
  0x2f   :  { %p156_p9 = pnand %p155_p8, %p149_p5 }
  0x31   :  { %159 = shalt.err (!%p156_p9)
}
  0x32   :  { %46 = dma.hbm_to_vmem [thread:$0]  %s283_s2, 256, %s41_s11, [#allocation6], %s190_s24, %s190_s24, %s191_s25  }
  0x33   :  { %182 = dma.done.wait [#allocation3], 256  }
  0x34   :  { %183 = vsyncadd [#allocation3], 4294967040 }
  0x35   :  { %184 = dma.done.wait [#allocation6], 512  }
  0x36   :  { %185 = vsyncadd [#allocation6], 4294966784  ;;  %v56_v0 = vld [vmem:[#allocation2] sm:$0xff]  ;;  %v58_v1 = vld [vmem:[#allocation5] sm:$0xff]  ;;  %s193_s21 = smov [#allocation8]  }
  0x37   :  { %v62_v2 = vsub.f32 %v56_v0, %v58_v1  ;;  %v57_v3 = vld [vmem:[#allocation2 + $0x8] sm:$0xff]  ;;  %v59_v4 = vld [vmem:[#allocation5 + $0x8] sm:$0xff]  ;;  %v60_v5 = vld [vmem:[#allocation7] sm:$0xff]  ;;  %s75_s22 = sshll.u32 %s193_s21, 4  ;;  %s76_s22 = int_to_ptr.vmem [resolvable:$true] %s75_s22 }
  0x38   :  { %v63_v6 = vsub.f32 %v57_v3, %v59_v4  ;;  %v61_v8 = vld [vmem:[#allocation7 + $0x8] sm:$0xff]  ;;  %s160_s2 = scalar_lea.vmem %s76_s22, 256  ;;  %p165_p11 = scmp.lt.s32.totalorder %s76_s22, %s76_s22 }
  0x39   :  { %v64_v7 = vmul.f32 %v62_v2, %v62_v2  ;;  %p161_p10 = scmp.ne.s32.totalorder %s76_s22, %s160_s2  ;;  %p166_p12 = scmp.lt.s32.totalorder %s160_s2, %s160_s2 }
  0x3a   :  { %v65_v9 = vmul.f32 %v63_v6, %v63_v6 }
  0x3b   :  { %v66_v10 = vmul.f32 %v64_v7, %v60_v5  ;;  %p167_p13 = por %p166_p12, %p165_p11 }
  0x3c   :  { %v67_v11 = vmul.f32 %v65_v9, %v61_v8 }
  0x3d   :  { %68 = vst [vmem:[#allocation8] sm:$0xff] %v66_v10  ;;  %p168_p0 = pnand %p167_p13, %p161_p10 }
  0x3e   :  { %69 = vst [vmem:[#allocation8 + $0x8] sm:$0xff] %v67_v11 }
  0x3f   :  { %171 = shalt.err (!%p168_p0)
}
  0x40   :  { %s172_s27 = scalar_lea.hbm %s284_s3, 256 }
  0x41   :  { %p173_p1 = scmp.ne.s32.totalorder %s284_s3, %s172_s27  ;;  %p176_p2 = scmp.lt.u32.totalorder %s172_s27, %s284_s3 }
  0x43   :  { %p178_p3 = pnand %p176_p2, %p173_p1 }
  0x45   :  { %181 = shalt.err (!%p178_p3)
}
  0x46   :  { %81 = dma.vmem_to_hbm [thread:$0]  %s76_s22, 256, %s284_s3, [#allocation4], %s190_s24, %s190_s24, %s191_s25  }
  0x47   :  { %186 = dma.done.wait [#allocation4], 256  }
  0x48   :  { %187 = vsyncadd [#allocation4], 4294967040 }
  0x49   :  { %85 = vsyncpa [#allocation3], 1 }
  0x4a   :  { %86 = vsyncpa [#allocation6], 1 }
  0x4b   :  { %87 = vsyncpa [#allocation4], 1 }

</bundles_post_ra>
